<compile_context>
chip_gen: v5e
topology: v5e:2x2
jax: 0.10.0
libtpu: 0.0.40
codegen_flags: <defaults>
</compile_context>

<pallas_src>
import functools

import jax
import jax.numpy as jnp
from jax.experimental import pallas as pl
from jax.experimental.pallas import tpu as pltpu

LANE = 128


def _round_up(v, m):
    return -(-v // m) * m


def _vmem_cap_bytes():
    """Per-generation scoped-VMEM budget: ~3/4 of physical VMEM.
    v5e/v6e (128 MiB physical) -> 96 MiB; v7x (64 MiB physical) -> 48 MiB."""
    phys = None
    try:
        phys = int(pltpu.get_tpu_info().vmem_capacity_bytes)
    except Exception:
        phys = None
    if not phys:
        try:
            kind = jax.devices()[0].device_kind.lower()
        except Exception:
            kind = ""
        phys = (64 if "7" in kind else 128) * 1024 * 1024
    return min((3 * phys) // 4, 96 * 1024 * 1024)


def choose_tiling(n, *, tm_target=512, tk_target=1024):
    """Pick (n_pad, tm, tk).  Tiles are multiples of 128 that divide n_pad.
    N is padded *up* to the tile grid rather than shrinking tiles to 128
    (256 KiB tiles sit at the per-grid-step-overhead knee)."""
    n128 = _round_up(max(n, 1), LANE)
    if n128 <= tk_target:
        tk = n128
        n_pad = n128
    else:
        num_k = -(-n128 // tk_target)
        tk = _round_up(-(-n128 // num_k), LANE)
        n_pad = _round_up(n128, tk)
    blocks = n_pad // LANE
    # Row tiles: near tm_target; >= 2 where possible so the "parallel" row
    # axis can shard across both TensorCores on v7x (1 TC on v5e/v6e).
    want_m = -(-n_pad // tm_target)
    if blocks >= 2:
        want_m = max(want_m, 2)
    num_m = want_m
    while blocks % num_m:
        num_m += 1
    tm = (blocks // num_m) * LANE
    return n_pad, tm, tk


def prepare_adjacency(adj_low, n_pad, dtype=jnp.bfloat16):
    """Cast (and zero-pad) the normalized adjacency once.  For a static graph
    this should be computed a single time and reused across layers/forwards
    (it is ~1.5 layer-equivalents of HBM traffic if redone per call)."""
    n = adj_low.shape[0]
    if n == n_pad:
        return adj_low.astype(dtype)
    return (jnp.zeros((n_pad, n_pad), dtype)
            .at[:n, :n].set(adj_low.astype(dtype)))


# ----------------------- feature transform: XW = x @ W -----------------------
def _xw_kernel(x_ref, w_ref, out_ref):
    out_ref[...] = jnp.dot(
        x_ref[...], w_ref[...], preferred_element_type=jnp.float32
    ).astype(out_ref.dtype)


def feature_transform(x, w, *, tm, out_dtype, vmem_limit):
    """x:(N_pad, F_in) @ w:(F_in, F_out_pad) -> (N_pad, F_out_pad), row-tiled.
    bf16 streams, f32 MXU accumulation."""
    n, f_in = x.shape
    f_out = w.shape[1]
    cost = pl.CostEstimate(
        flops=2 * n * f_in * f_out,
        transcendentals=0,
        bytes_accessed=int(x.size * x.dtype.itemsize
                           + w.size * w.dtype.itemsize
                           + n * f_out * jnp.dtype(out_dtype).itemsize),
    )
    return pl.pallas_call(
        _xw_kernel,
        out_shape=jax.ShapeDtypeStruct((n, f_out), out_dtype),
        grid_spec=pltpu.PrefetchScalarGridSpec(
            num_scalar_prefetch=0,
            grid=(n // tm,),
            in_specs=[
                pl.BlockSpec((tm, f_in), lambda i: (i, 0)),      # row tile of x
                pl.BlockSpec((f_in, f_out), lambda i: (0, 0)),   # grid-invariant W
            ],
            out_specs=pl.BlockSpec((tm, f_out), lambda i: (i, 0)),
        ),
        compiler_params=pltpu.CompilerParams(
            dimension_semantics=("parallel",),
            vmem_limit_bytes=vmem_limit,
        ),
        cost_estimate=cost,
    )(x, w)


# ------------------- neighbor aggregation: out = adj @ XW --------------------
def _aggregate_kernel(adj_ref, xw_ref, out_ref, *scratch,
                      apply_relu, xw_resident):
    k = pl.program_id(1)
    # When no scratch is given the output is f32 and we accumulate directly
    # into out_ref (its block index is invariant in k, so it stays resident).
    acc_ref = scratch[0] if scratch else out_ref

    @pl.when(k == 0)
    def _():
        acc_ref[...] = jnp.zeros_like(acc_ref)

    tk = adj_ref.shape[1]
    if xw_resident:
        start = pl.multiple_of(k * tk, tk)
        xw = xw_ref[pl.ds(start, tk), :]      # slice the VMEM-resident slab
    else:
        xw = xw_ref[...]
    acc_ref[...] += jnp.dot(adj_ref[...], xw, preferred_element_type=jnp.float32)

    if apply_relu or scratch:
        @pl.when(k == pl.num_programs(1) - 1)
        def _():
            y = acc_ref[...]
            if apply_relu:
                y = jnp.maximum(y, 0.0)
            out_ref[...] = y.astype(out_ref.dtype)


def adj_aggregate(adj, xw, *, apply_relu, tm, tk, out_dtype, xw_resident,
                  vmem_limit):
    """out = [relu](adj @ xw); adj:(N_pad,N_pad) bf16, xw:(N_pad,F_out_pad) bf16."""
    n = adj.shape[0]
    f_out = xw.shape[1]
    num_m = n // tm
    use_acc = jnp.dtype(out_dtype) != jnp.dtype(jnp.float32)

    xw_stream_copies = 1 if xw_resident else num_m
    cost = pl.CostEstimate(
        flops=2 * n * n * f_out,
        transcendentals=0,
        bytes_accessed=int(adj.size * adj.dtype.itemsize
                           + xw.size * xw.dtype.itemsize * xw_stream_copies
                           + n * f_out * jnp.dtype(out_dtype).itemsize),
    )
    if xw_resident:
        # Full-extent, grid-invariant block -> DMA'd once, stays in VMEM.
        xw_spec = pl.BlockSpec((n, f_out), lambda i, k: (0, 0))
    else:
        xw_spec = pl.BlockSpec((tk, f_out), lambda i, k: (k, 0))
    scratch_shapes = [pltpu.VMEM((tm, f_out), jnp.float32)] if use_acc else []

    return pl.pallas_call(
        functools.partial(_aggregate_kernel, apply_relu=apply_relu,
                          xw_resident=xw_resident),
        out_shape=jax.ShapeDtypeStruct((n, f_out), out_dtype),
        grid_spec=pltpu.PrefetchScalarGridSpec(
            num_scalar_prefetch=0,
            grid=(num_m, n // tk),                  # (row tiles, neighbor tiles)
            in_specs=[
                pl.BlockSpec((tm, tk), lambda i, k: (i, k)),    # adj tile stream
                xw_spec,
            ],
            out_specs=pl.BlockSpec((tm, f_out), lambda i, k: (i, 0)),
            scratch_shapes=scratch_shapes,
        ),
        compiler_params=pltpu.CompilerParams(
            dimension_semantics=("parallel", "arbitrary"),
            vmem_limit_bytes=vmem_limit,
        ),
        cost_estimate=cost,
    )(adj, xw)


# ------------------------------- GCN forward ---------------------------------
def gcn_layer(adj_c, feats, w_pad, *, apply_relu, tm, tk, out_dtype,
              xw_resident, vmem_limit, compute_dtype):
    # Hoisted feature transform (computed once, bf16 stream / f32 acc), then
    # the K-tiled neighbor aggregation against the (resident) XW slab.
    xw = feature_transform(feats, w_pad, tm=tm, out_dtype=compute_dtype,
                           vmem_limit=vmem_limit)
    return adj_aggregate(adj_c, xw, apply_relu=apply_relu, tm=tm, tk=tk,
                         out_dtype=out_dtype, xw_resident=xw_resident,
                         vmem_limit=vmem_limit)


def gcn_forward(x, adj_low, adj_high, adj_low_unnormalized, params,
                dropout=0.5, training=False, *, adj_prepared=None,
                compute_dtype=jnp.bfloat16, tm_target=512, tk_target=1024):
    """GCN forward (model_type='gcn', eval mode => dropout is identity)."""
    del adj_high, adj_low_unnormalized  # unused for model_type='gcn'
    # TODO(synk): F.dropout with training=True needs RNG masking; eval-mode
    # semantics (identity) are implemented here.
    del dropout, training

    n, nfeat = x.shape
    w0, w1 = params["w_low_0"], params["w_low_1"]
    nhid, nclass = w0.shape[1], w1.shape[1]

    n_pad, tm, tk = choose_tiling(n, tm_target=tm_target, tk_target=tk_target)
    nhid_pad = _round_up(nhid, LANE)
    nclass_pad = _round_up(nclass, LANE)
    f_out_max = max(nhid_pad, nclass_pad)

    cap = _vmem_cap_bytes()
    # Keep XW VMEM-resident when (double-buffered) slab + adj tiles + output
    # tiles + acc scratch fit comfortably in the per-generation budget.
    resident_bytes = (2 * n_pad * f_out_max * 2      # XW slab (bf16, 2 bufs)
                      + 2 * tm * tk * 2              # adj tiles (bf16, 2 bufs)
                      + 2 * tm * f_out_max * 4       # out tiles (f32, 2 bufs)
                      + tm * f_out_max * 4)          # acc scratch (layer 1)
    xw_resident = resident_bytes <= (cap * 3) // 4

    # Adjacency: use the cached/pre-padded bf16 version when provided (static
    # graph), otherwise cast+pad once here (shared by both layers).
    if adj_prepared is not None and adj_prepared.shape == (n_pad, n_pad):
        adj_c = adj_prepared.astype(compute_dtype)
    else:
        adj_c = prepare_adjacency(adj_low, n_pad, compute_dtype)

    # Zero padding: padded nodes are isolated (zero adj rows/cols, zero
    # features) and padded feature lanes have zero weights, so slicing back
    # recovers the exact unpadded result.
    x_p = (jnp.zeros((n_pad, nfeat), compute_dtype)
           .at[:n, :].set(x.astype(compute_dtype)))
    w0_p = (jnp.zeros((nfeat, nhid_pad), compute_dtype)
            .at[:, :nhid].set(w0.astype(compute_dtype)))
    w1_p = (jnp.zeros((nhid_pad, nclass_pad), compute_dtype)
            .at[:nhid, :nclass].set(w1.astype(compute_dtype)))

    # Layer 1: bf16 activations out (halves fea1 HBM traffic), f32 scratch acc.
    fea1 = gcn_layer(adj_c, x_p, w0_p, apply_relu=True, tm=tm, tk=tk,
                     out_dtype=compute_dtype, xw_resident=xw_resident,
                     vmem_limit=cap, compute_dtype=compute_dtype)
    # Layer 2: f32 output, accumulated directly into out_ref (no scratch).
    fea2 = gcn_layer(adj_c, fea1, w1_p, apply_relu=False, tm=tm, tk=tk,
                     out_dtype=jnp.float32, xw_resident=xw_resident,
                     vmem_limit=cap, compute_dtype=compute_dtype)
    return fea2[:n, :nclass]


# ----------------------------- setup / demo ----------------------------------
def init_params(key, nfeat, nhid, nclass):
    """GraphConvolution.reset_parameters: U(-stdv, stdv), stdv=1/sqrt(out)."""
    k0, k1 = jax.random.split(key)
    stdv0 = 1.0 / jnp.sqrt(nhid)
    stdv1 = 1.0 / jnp.sqrt(nclass)
    return {
        "w_low_0": jax.random.uniform(k0, (nfeat, nhid), jnp.float32,
                                      -stdv0, stdv0),
        "w_low_1": jax.random.uniform(k1, (nhid, nclass), jnp.float32,
                                      -stdv1, stdv1),
    }


def make_normalized_adj(key, n_nodes):
    """Dense symmetric normalized adjacency D^-1/2 (A + I) D^-1/2."""
    a = (jax.random.uniform(key, (n_nodes, n_nodes)) > 0.85).astype(jnp.float32)
    a = jnp.maximum(a, a.T)                       # symmetrize
    a = a + jnp.eye(n_nodes, dtype=jnp.float32)   # self loops
    deg = a.sum(axis=1)
    d_inv_sqrt = 1.0 / jnp.sqrt(deg)
    adj_low = a * d_inv_sqrt[:, None] * d_inv_sqrt[None, :]
    adj_high = jnp.eye(n_nodes, dtype=jnp.float32) - adj_low
    return adj_low, adj_high, a


if __name__ == "__main__":
    nnodes, nfeat, nhid, nclass = 64, 32, 32, 8

    key = jax.random.PRNGKey(0)
    k_x, k_adj, k_p = jax.random.split(key, 3)

    x = jax.random.normal(k_x, (nnodes, nfeat), dtype=jnp.float32)
    adj_low, adj_high, adj_low_unnorm = make_normalized_adj(k_adj, nnodes)
    params = init_params(k_p, nfeat, nhid, nclass)

    # Hoist the adjacency cast/pad out of the forward path (static graph):
    # this is the cacheable/pre-computed bf16 adjacency reused every forward.
    n_pad, _, _ = choose_tiling(nnodes)
    adj_c = prepare_adjacency(adj_low, n_pad, jnp.bfloat16)

    fwd = jax.jit(gcn_forward)
    out = fwd(x, adj_low, adj_high, adj_low_unnorm, params, adj_prepared=adj_c)
    out = jax.block_until_ready(out)
    assert out.shape == (nnodes, nclass)

    # Reference matching the kernel's precision choices (bf16 adj / activation
    # / weight streams, f32 MXU accumulation).
    cd = jnp.bfloat16
    adj16 = adj_low.astype(cd)
    x16 = x.astype(cd)
    w0_16 = params["w_low_0"].astype(cd)
    w1_16 = params["w_low_1"].astype(cd)
    xw1 = jnp.dot(x16, w0_16, preferred_element_type=jnp.float32).astype(cd)
    fea1_ref = jnp.maximum(
        jnp.dot(adj16, xw1, preferred_element_type=jnp.float32), 0.0).astype(cd)
    xw2 = jnp.dot(fea1_ref, w1_16, preferred_element_type=jnp.float32).astype(cd)
    ref_matched = jnp.dot(adj16, xw2, preferred_element_type=jnp.float32)
    assert jnp.allclose(out, ref_matched, atol=2e-2, rtol=2e-2)

    # Loose check against full-f32 math (the PyTorch eval-mode result).
    fea1_f32 = jnp.maximum(adj_low @ (x @ params["w_low_0"]), 0.0)
    ref_f32 = adj_low @ (fea1_f32 @ params["w_low_1"])
    assert jnp.allclose(out, ref_f32, atol=5e-2, rtol=5e-2)

    print("KERNEL_OK")
</pallas_src>

<mosaic_0001>
module attributes {stable_mosaic.version = 11 : i64} {
  func.func @_xw_kernel(%arg0: i32, %arg1: memref<128x32xbf16, #tpu.memory_space<vmem>>, %arg2: memref<32x128xbf16, #tpu.memory_space<vmem>>, %arg3: memref<128x128xbf16, #tpu.memory_space<vmem>>) attributes {dimension_semantics = [#tpu.dimension_semantics<parallel>], iteration_bounds = array<i64: 1>, scalar_prefetch = 0 : i64, scratch_operands = 0 : i64, tpu.core_type = #tpu.core_type<tc>, window_params = [{transform_indices = @transform_0, window_bounds = array<i64: 128, 32>}, {pipeline_mode = #tpu.pipeline_mode<synchronous>, transform_indices = @transform_1, window_bounds = array<i64: 32, 128>}, {transform_indices = @transform_2, window_bounds = array<i64: 128, 128>}]} {
    %c0 = arith.constant 0 : index
    %c0_0 = arith.constant 0 : index
    %0 = vector.load %arg1[%c0, %c0_0] : memref<128x32xbf16, #tpu.memory_space<vmem>>, vector<128x32xbf16>
    %c0_1 = arith.constant 0 : index
    %c0_2 = arith.constant 0 : index
    %1 = vector.load %arg2[%c0_1, %c0_2] : memref<32x128xbf16, #tpu.memory_space<vmem>>, vector<32x128xbf16>
    %cst = arith.constant dense<0.000000e+00> : vector<128x128xf32>
    %2 = tpu.matmul %0, %1, %cst {dimension_numbers = #tpu.dot_dimension_numbers<[1], [0], [0], [1], [0, 0, 1, 1], [], []>} : vector<128x32xbf16>, vector<32x128xbf16>, vector<128x128xf32> -> vector<128x128xf32>
    %3 = arith.truncf %2 : vector<128x128xf32> to vector<128x128xbf16>
    %c0_3 = arith.constant 0 : index
    %c0_4 = arith.constant 0 : index
    %4 = vector.load %arg3[%c0_3, %c0_4] : memref<128x128xbf16, #tpu.memory_space<vmem>>, vector<128x128xbf16>
    tpu.vector_store %arg3[%c0_3, %c0_4], %3 {strides = array<i32>} : memref<128x128xbf16, #tpu.memory_space<vmem>>, vector<128x128xbf16>,
    return
  }
  func.func @transform_0(%arg0: i32) -> (i32, i32) {
    %c0_i32 = arith.constant 0 : i32
    %c0_i32_0 = arith.constant 0 : i32
    return %arg0, %c0_i32 : i32, i32
  }
  func.func @transform_1(%arg0: i32) -> (i32, i32) {
    %c0_i32 = arith.constant 0 : i32
    %c0_i32_0 = arith.constant 0 : i32
    %c0_i32_1 = arith.constant 0 : i32
    return %c0_i32, %c0_i32_0 : i32, i32
  }
  func.func @transform_2(%arg0: i32) -> (i32, i32) {
    %c0_i32 = arith.constant 0 : i32
    %c0_i32_0 = arith.constant 0 : i32
    return %arg0, %c0_i32 : i32, i32
  }
}

module attributes {stable_mosaic.version = 11 : i64} {
  func.func @_aggregate_kernel(%arg0: i32, %arg1: i32, %arg2: memref<128x128xbf16, #tpu.memory_space<vmem>>, %arg3: memref<128x128xbf16, #tpu.memory_space<vmem>>, %arg4: memref<128x128xbf16, #tpu.memory_space<vmem>>, %arg5: memref<128x128xf32, #tpu.memory_space<vmem>>) attributes {dimension_semantics = [#tpu.dimension_semantics<parallel>, #tpu.dimension_semantics<arbitrary>], iteration_bounds = array<i64: 1, 1>, scalar_prefetch = 0 : i64, scratch_operands = 1 : i64, tpu.core_type = #tpu.core_type<tc>, window_params = [{transform_indices = @transform_0, window_bounds = array<i64: 128, 128>}, {pipeline_mode = #tpu.pipeline_mode<synchronous>, transform_indices = @transform_1, window_bounds = array<i64: 128, 128>}, {transform_indices = @transform_2, window_bounds = array<i64: 128, 128>}]} {
    %c0_i32 = arith.constant 0 : i32
    %0 = arith.cmpi eq, %arg1, %c0_i32 : i32
    %1 = arith.extui %0 : i1 to i32
    %c0_i32_0 = arith.constant 0 : i32
    %2 = arith.cmpi ne, %1, %c0_i32_0 : i32
    scf.if %2 {
      %cst_9 = arith.constant 0.000000e+00 : f32
      %15 = vector.broadcast %cst_9 : f32 to vector<128x128xf32>
      %c0_10 = arith.constant 0 : index
      %c0_11 = arith.constant 0 : index
      %16 = vector.load %arg5[%c0_10, %c0_11] : memref<128x128xf32, #tpu.memory_space<vmem>>, vector<128x128xf32>
      tpu.vector_store %arg5[%c0_10, %c0_11], %15 {strides = array<i32>} : memref<128x128xf32, #tpu.memory_space<vmem>>, vector<128x128xf32>,
    } else {
    }
    %c128_i32 = arith.constant 128 : i32
    %3 = arith.muli %arg1, %c128_i32 : i32
    %4 = tpu.assume_multiple %3, 128 : i32
    %5 = arith.index_cast %4 : i32 to index
    %c0 = arith.constant 0 : index
    %6 = vector.load %arg3[%5, %c0] : memref<128x128xbf16, #tpu.memory_space<vmem>>, vector<128x128xbf16>
    %c0_1 = arith.constant 0 : index
    %c0_2 = arith.constant 0 : index
    %7 = vector.load %arg5[%c0_1, %c0_2] : memref<128x128xf32, #tpu.memory_space<vmem>>, vector<128x128xf32>
    %c0_3 = arith.constant 0 : index
    %c0_4 = arith.constant 0 : index
    %8 = vector.load %arg2[%c0_3, %c0_4] : memref<128x128xbf16, #tpu.memory_space<vmem>>, vector<128x128xbf16>
    %cst = arith.constant dense<0.000000e+00> : vector<128x128xf32>
    %9 = tpu.matmul %8, %6, %cst {dimension_numbers = #tpu.dot_dimension_numbers<[1], [0], [0], [1], [0, 0, 1, 1], [], []>} : vector<128x128xbf16>, vector<128x128xbf16>, vector<128x128xf32> -> vector<128x128xf32>
    %10 = arith.addf %7, %9 : vector<128x128xf32>
    %c0_5 = arith.constant 0 : index
    %c0_6 = arith.constant 0 : index
    %11 = vector.load %arg5[%c0_5, %c0_6] : memref<128x128xf32, #tpu.memory_space<vmem>>, vector<128x128xf32>
    tpu.vector_store %arg5[%c0_5, %c0_6], %10 {strides = array<i32>} : memref<128x128xf32, #tpu.memory_space<vmem>>, vector<128x128xf32>,
    %c0_i32_7 = arith.constant 0 : i32
    %12 = arith.cmpi eq, %arg1, %c0_i32_7 : i32
    %13 = arith.extui %12 : i1 to i32
    %c0_i32_8 = arith.constant 0 : i32
    %14 = arith.cmpi ne, %13, %c0_i32_8 : i32
    scf.if %14 {
      %c0_9 = arith.constant 0 : index
      %c0_10 = arith.constant 0 : index
      %15 = vector.load %arg5[%c0_9, %c0_10] : memref<128x128xf32, #tpu.memory_space<vmem>>, vector<128x128xf32>
      %cst_11 = arith.constant 0.000000e+00 : f32
      %16 = vector.broadcast %cst_11 : f32 to vector<128x128xf32>
      %17 = arith.maximumf %15, %16 : vector<128x128xf32>
      %18 = arith.truncf %17 : vector<128x128xf32> to vector<128x128xbf16>
      %c0_12 = arith.constant 0 : index
      %c0_13 = arith.constant 0 : index
      %19 = vector.load %arg4[%c0_12, %c0_13] : memref<128x128xbf16, #tpu.memory_space<vmem>>, vector<128x128xbf16>
      tpu.vector_store %arg4[%c0_12, %c0_13], %18 {strides = array<i32>} : memref<128x128xbf16, #tpu.memory_space<vmem>>, vector<128x128xbf16>,
    } else {
    }
    return
  }
  func.func @transform_0(%arg0: i32, %arg1: i32) -> (i32, i32) {
    %c0_i32 = arith.constant 0 : i32
    return %arg0, %arg1 : i32, i32
  }
  func.func @transform_1(%arg0: i32, %arg1: i32) -> (i32, i32) {
    %c0_i32 = arith.constant 0 : i32
    %c0_i32_0 = arith.constant 0 : i32
    %c0_i32_1 = arith.constant 0 : i32
    return %c0_i32, %c0_i32_0 : i32, i32
  }
  func.func @transform_2(%arg0: i32, %arg1: i32) -> (i32, i32) {
    %c0_i32 = arith.constant 0 : i32
    %c0_i32_0 = arith.constant 0 : i32
    return %arg0, %c0_i32 : i32, i32
  }
}

module attributes {stable_mosaic.version = 11 : i64} {
  func.func @_xw_kernel(%arg0: i32, %arg1: memref<128x128xbf16, #tpu.memory_space<vmem>>, %arg2: memref<128x128xbf16, #tpu.memory_space<vmem>>, %arg3: memref<128x128xbf16, #tpu.memory_space<vmem>>) attributes {dimension_semantics = [#tpu.dimension_semantics<parallel>], iteration_bounds = array<i64: 1>, scalar_prefetch = 0 : i64, scratch_operands = 0 : i64, tpu.core_type = #tpu.core_type<tc>, window_params = [{transform_indices = @transform_0, window_bounds = array<i64: 128, 128>}, {pipeline_mode = #tpu.pipeline_mode<synchronous>, transform_indices = @transform_1, window_bounds = array<i64: 128, 128>}, {transform_indices = @transform_2, window_bounds = array<i64: 128, 128>}]} {
    %c0 = arith.constant 0 : index
    %c0_0 = arith.constant 0 : index
    %0 = vector.load %arg1[%c0, %c0_0] : memref<128x128xbf16, #tpu.memory_space<vmem>>, vector<128x128xbf16>
    %c0_1 = arith.constant 0 : index
    %c0_2 = arith.constant 0 : index
    %1 = vector.load %arg2[%c0_1, %c0_2] : memref<128x128xbf16, #tpu.memory_space<vmem>>, vector<128x128xbf16>
    %cst = arith.constant dense<0.000000e+00> : vector<128x128xf32>
    %2 = tpu.matmul %0, %1, %cst {dimension_numbers = #tpu.dot_dimension_numbers<[1], [0], [0], [1], [0, 0, 1, 1], [], []>} : vector<128x128xbf16>, vector<128x128xbf16>, vector<128x128xf32> -> vector<128x128xf32>
    %3 = arith.truncf %2 : vector<128x128xf32> to vector<128x128xbf16>
    %c0_3 = arith.constant 0 : index
    %c0_4 = arith.constant 0 : index
    %4 = vector.load %arg3[%c0_3, %c0_4] : memref<128x128xbf16, #tpu.memory_space<vmem>>, vector<128x128xbf16>
    tpu.vector_store %arg3[%c0_3, %c0_4], %3 {strides = array<i32>} : memref<128x128xbf16, #tpu.memory_space<vmem>>, vector<128x128xbf16>,
    return
  }
  func.func @transform_0(%arg0: i32) -> (i32, i32) {
    %c0_i32 = arith.constant 0 : i32
    %c0_i32_0 = arith.constant 0 : i32
    return %arg0, %c0_i32 : i32, i32
  }
  func.func @transform_1(%arg0: i32) -> (i32, i32) {
    %c0_i32 = arith.constant 0 : i32
    %c0_i32_0 = arith.constant 0 : i32
    %c0_i32_1 = arith.constant 0 : i32
    return %c0_i32, %c0_i32_0 : i32, i32
  }
  func.func @transform_2(%arg0: i32) -> (i32, i32) {
    %c0_i32 = arith.constant 0 : i32
    %c0_i32_0 = arith.constant 0 : i32
    return %arg0, %c0_i32 : i32, i32
  }
}

module attributes {stable_mosaic.version = 11 : i64} {
  func.func @_aggregate_kernel(%arg0: i32, %arg1: i32, %arg2: memref<128x128xbf16, #tpu.memory_space<vmem>>, %arg3: memref<128x128xbf16, #tpu.memory_space<vmem>>, %arg4: memref<128x128xf32, #tpu.memory_space<vmem>>) attributes {dimension_semantics = [#tpu.dimension_semantics<parallel>, #tpu.dimension_semantics<arbitrary>], iteration_bounds = array<i64: 1, 1>, scalar_prefetch = 0 : i64, scratch_operands = 0 : i64, tpu.core_type = #tpu.core_type<tc>, window_params = [{transform_indices = @transform_0, window_bounds = array<i64: 128, 128>}, {pipeline_mode = #tpu.pipeline_mode<synchronous>, transform_indices = @transform_1, window_bounds = array<i64: 128, 128>}, {transform_indices = @transform_2, window_bounds = array<i64: 128, 128>}]} {
    %c0_i32 = arith.constant 0 : i32
    %0 = arith.cmpi eq, %arg1, %c0_i32 : i32
    %1 = arith.extui %0 : i1 to i32
    %c0_i32_0 = arith.constant 0 : i32
    %2 = arith.cmpi ne, %1, %c0_i32_0 : i32
    scf.if %2 {
      %cst_7 = arith.constant 0.000000e+00 : f32
      %12 = vector.broadcast %cst_7 : f32 to vector<128x128xf32>
      %c0_8 = arith.constant 0 : index
      %c0_9 = arith.constant 0 : index
      %13 = vector.load %arg4[%c0_8, %c0_9] : memref<128x128xf32, #tpu.memory_space<vmem>>, vector<128x128xf32>
      tpu.vector_store %arg4[%c0_8, %c0_9], %12 {strides = array<i32>} : memref<128x128xf32, #tpu.memory_space<vmem>>, vector<128x128xf32>,
    } else {
    }
    %c128_i32 = arith.constant 128 : i32
    %3 = arith.muli %arg1, %c128_i32 : i32
    %4 = tpu.assume_multiple %3, 128 : i32
    %5 = arith.index_cast %4 : i32 to index
    %c0 = arith.constant 0 : index
    %6 = vector.load %arg3[%5, %c0] : memref<128x128xbf16, #tpu.memory_space<vmem>>, vector<128x128xbf16>
    %c0_1 = arith.constant 0 : index
    %c0_2 = arith.constant 0 : index
    %7 = vector.load %arg4[%c0_1, %c0_2] : memref<128x128xf32, #tpu.memory_space<vmem>>, vector<128x128xf32>
    %c0_3 = arith.constant 0 : index
    %c0_4 = arith.constant 0 : index
    %8 = vector.load %arg2[%c0_3, %c0_4] : memref<128x128xbf16, #tpu.memory_space<vmem>>, vector<128x128xbf16>
    %cst = arith.constant dense<0.000000e+00> : vector<128x128xf32>
    %9 = tpu.matmul %8, %6, %cst {dimension_numbers = #tpu.dot_dimension_numbers<[1], [0], [0], [1], [0, 0, 1, 1], [], []>} : vector<128x128xbf16>, vector<128x128xbf16>, vector<128x128xf32> -> vector<128x128xf32>
    %10 = arith.addf %7, %9 : vector<128x128xf32>
    %c0_5 = arith.constant 0 : index
    %c0_6 = arith.constant 0 : index
    %11 = vector.load %arg4[%c0_5, %c0_6] : memref<128x128xf32, #tpu.memory_space<vmem>>, vector<128x128xf32>
    tpu.vector_store %arg4[%c0_5, %c0_6], %10 {strides = array<i32>} : memref<128x128xf32, #tpu.memory_space<vmem>>, vector<128x128xf32>,
    return
  }
  func.func @transform_0(%arg0: i32, %arg1: i32) -> (i32, i32) {
    %c0_i32 = arith.constant 0 : i32
    return %arg0, %arg1 : i32, i32
  }
  func.func @transform_1(%arg0: i32, %arg1: i32) -> (i32, i32) {
    %c0_i32 = arith.constant 0 : i32
    %c0_i32_0 = arith.constant 0 : i32
    %c0_i32_1 = arith.constant 0 : i32
    return %c0_i32, %c0_i32_0 : i32, i32
  }
  func.func @transform_2(%arg0: i32, %arg1: i32) -> (i32, i32) {
    %c0_i32 = arith.constant 0 : i32
    %c0_i32_0 = arith.constant 0 : i32
    return %arg0, %c0_i32 : i32, i32
  }
}

</mosaic_0001>

<bundles_post_ra>
// kernel: gcn_forward.4
= control target key start
LH: loop header
LB: loop body
LE: loop exit
PB: predicated region body
PF: predicated region fallthrough
CT: control target
= control target key end

     0   :  { %vm84_vm0 = vcmask 261120   ;;  %s382_s1 = inlined_call_operand.vmem [shape: bf16[32,128], index: 1, kind: input, shape index: {}]   ;;  %s383_s0 = inlined_call_operand.vmem [shape: bf16[128,32], index: 0, kind: input, shape index: {}]   ;;  %s384_s2 = inlined_call_operand.vmem [shape: bf16[128,128], index: 2, kind: output, shape index: {}]  }
   0x1   :  { %v251_v0 = vld [vmem:[%s382_s1 + $0x8] sm:$0xff]  ;;  %v250_v1 = vld [vmem:[%s382_s1] sm:$0xff]  ;;  %v244_v3 = vld [vmem:[%s383_s0 + $0x10] sm:$0xff] }
   0x2   :  { %115 = vmatpush.bf16.msra.mxu0 %v251_v0  ;;  %299 = vmatpush.bf16.msra.mxu1 %v251_v0  ;;  %v242_v2 = vld [vmem:[%s383_s0] sm:$0xff]  ;;  %v248_v5 = vld [vmem:[%s383_s0 + $0x30] sm:$0xff]  ;;  %v243_v6 = vld [vmem:[%s383_s0 + $0x8] sm:$0xff] }
   0x3   :  { %300 = vmatpush.bf16.msra.mxu2 %v251_v0  ;;  %301 = vmatpush.bf16.msra.mxu3 %v251_v0  ;;  %v246_v4 = vld [vmem:[%s383_s0 + $0x20] sm:$0xff]  ;;  %v245_v7 = vld [vmem:[%s383_s0 + $0x18] sm:$0xff]  ;;  %v247_v8 = vld [vmem:[%s383_s0 + $0x28] sm:$0xff] }
   0x4   :  { %v249_v9 = vld [vmem:[%s383_s0 + $0x38] sm:$0xff] }
   0x6   :  { %116 = vmatpush.bf16.msra.mxu0 %v250_v1  ;;  %302 = vmatpush.bf16.msra.mxu1 %v250_v1 }
   0x7   :  { %303 = vmatpush.bf16.msra.mxu2 %v250_v1  ;;  %304 = vmatpush.bf16.msra.mxu3 %v250_v1 }
   0x9   :  { %234 = vmatmul.msk.bf16.vlgmr.msra.gmra.mxu0 %vm84_vm0, %v242_v2  ;;  %236 = vmatmul.msk.bf16.vlgmr.msra.gmra.mxu1 %vm84_vm0, %v244_v3 }
   0xa   :  { %238 = vmatmul.msk.bf16.vlgmr.msra.gmra.mxu2 %vm84_vm0, %v246_v4  ;;  %240 = vmatmul.msk.bf16.vlgmr.msra.gmra.mxu3 %vm84_vm0, %v248_v5 }
  0x19   :  { %235 = vmatmul.msk.bf16.gmra.mxu0 %vm84_vm0, %v243_v6  ;;  %237 = vmatmul.msk.bf16.gmra.mxu1 %vm84_vm0, %v245_v7 }
  0x1a   :  { %239 = vmatmul.msk.bf16.gmra.mxu2 %vm84_vm0, %v247_v8  ;;  %241 = vmatmul.msk.bf16.gmra.mxu3 %vm84_vm0, %v249_v9 }
  0x86   :  { %v118_v10 = vpop.f32.mrf.mxu0  ;;  %v128_v11 = vpop.f32.mrf.mxu1 }
  0x8d   :  { %v138_v12 = vpop.f32.mrf.mxu2  ;;  %v148_v13 = vpop.f32.mrf.mxu3 }
  0x8e   :  { %v120_v14 = vpop.f32.mrf.mxu0  ;;  %v130_v15 = vpop.f32.mrf.mxu1 }
  0x8f   :  { %v255_v16 = vpack.c.bf16 %v120_v14, %v118_v10  ;;  %v265_v17 = vpack.c.bf16 %v130_v15, %v128_v11 }
  0x91   :  { %256 = vst [vmem:[%s384_s2] sm:$0xff] %v255_v16  }
  0x92   :  { %293 = vst [vmem:[%s384_s2 + $0x10] sm:$0xff] %v265_v17  }
  0x95   :  { %v140_v18 = vpop.f32.mrf.mxu2  ;;  %v150_v19 = vpop.f32.mrf.mxu3 }
  0x96   :  { %v275_v20 = vpack.c.bf16 %v140_v18, %v138_v12  ;;  %v285_v21 = vpack.c.bf16 %v150_v19, %v148_v13  ;;  %v123_v22 = vpop.f32.mrf.mxu0  ;;  %v133_v23 = vpop.f32.mrf.mxu1 }
  0x98   :  { %295 = vst [vmem:[%s384_s2 + $0x20] sm:$0xff] %v275_v20  }
  0x99   :  { %297 = vst [vmem:[%s384_s2 + $0x30] sm:$0xff] %v285_v21  }
  0x9d   :  { %v143_v24 = vpop.f32.mrf.mxu2  ;;  %v153_v25 = vpop.f32.mrf.mxu3 }
  0x9e   :  { %v125_v26 = vpop.f32.mrf.mxu0  ;;  %v135_v27 = vpop.f32.mrf.mxu1 }
  0x9f   :  { %v260_v28 = vpack.c.bf16 %v125_v26, %v123_v22  ;;  %v270_v29 = vpack.c.bf16 %v135_v27, %v133_v23 }
  0xa1   :  { %292 = vst [vmem:[%s384_s2 + $0x8] sm:$0xff] %v260_v28  }
  0xa2   :  { %294 = vst [vmem:[%s384_s2 + $0x18] sm:$0xff] %v270_v29  }
  0xa5   :  { %v145_v30 = vpop.f32.mrf.mxu2  ;;  %v155_v31 = vpop.f32.mrf.mxu3 }
  0xa6   :  { %v280_v32 = vpack.c.bf16 %v145_v30, %v143_v24  ;;  %v290_v33 = vpack.c.bf16 %v155_v31, %v153_v25 }
  0xa8   :  { %296 = vst [vmem:[%s384_s2 + $0x28] sm:$0xff] %v280_v32  }
  0xa9   :  { %298 = vst [vmem:[%s384_s2 + $0x38] sm:$0xff] %v290_v33  }

// kernel: gcn_forward.5
= control target key start
LH: loop header
LB: loop body
LE: loop exit
PB: predicated region body
PF: predicated region fallthrough
CT: control target
= control target key end

     0   :  { %s572_s1 = inlined_call_operand.vmem [shape: bf16[128,128], index: 1, kind: input, shape index: {}]   ;;  %s573_s0 = inlined_call_operand.vmem [shape: bf16[128,128], index: 0, kind: input, shape index: {}]   ;;  %s574_s2 = inlined_call_operand.vmem [shape: bf16[128,128], index: 2, kind: output, shape index: {}]  }
   0x1   :  { %v405_v0 = vld [vmem:[%s572_s1 + $0x38] sm:$0xff]  ;;  %v404_v1 = vld [vmem:[%s572_s1 + $0x30] sm:$0xff]  ;;  %v403_v2 = vld [vmem:[%s572_s1 + $0x28] sm:$0xff] }
   0x2   :  { %180 = vmatpush.bf16.msra.mxu0 %v405_v0  ;;  %461 = vmatpush.bf16.msra.mxu1 %v405_v0  ;;  %v402_v3 = vld [vmem:[%s572_s1 + $0x20] sm:$0xff]  ;;  %v401_v4 = vld [vmem:[%s572_s1 + $0x18] sm:$0xff]  ;;  %v400_v5 = vld [vmem:[%s572_s1 + $0x10] sm:$0xff] }
   0x3   :  { %462 = vmatpush.bf16.msra.mxu2 %v405_v0  ;;  %463 = vmatpush.bf16.msra.mxu3 %v405_v0  ;;  %v399_v6 = vld [vmem:[%s572_s1 + $0x8] sm:$0xff]  ;;  %v398_v7 = vld [vmem:[%s572_s1] sm:$0xff]  ;;  %v408_v9 = vld [vmem:[%s573_s0 + $0x10] sm:$0xff] }
   0x4   :  { %v406_v8 = vld [vmem:[%s573_s0] sm:$0xff]  ;;  %v412_v11 = vld [vmem:[%s573_s0 + $0x30] sm:$0xff]  ;;  %v407_v12 = vld [vmem:[%s573_s0 + $0x8] sm:$0xff] }
   0x5   :  { %v410_v10 = vld [vmem:[%s573_s0 + $0x20] sm:$0xff]  ;;  %v409_v13 = vld [vmem:[%s573_s0 + $0x18] sm:$0xff]  ;;  %v411_v14 = vld [vmem:[%s573_s0 + $0x28] sm:$0xff] }
   0x6   :  { %181 = vmatpush.bf16.msra.mxu0 %v404_v1  ;;  %464 = vmatpush.bf16.msra.mxu1 %v404_v1  ;;  %v413_v15 = vld [vmem:[%s573_s0 + $0x38] sm:$0xff] }
   0x7   :  { %465 = vmatpush.bf16.msra.mxu2 %v404_v1  ;;  %466 = vmatpush.bf16.msra.mxu3 %v404_v1 }
   0xa   :  { %182 = vmatpush.bf16.msra.mxu0 %v403_v2  ;;  %467 = vmatpush.bf16.msra.mxu1 %v403_v2 }
   0xb   :  { %468 = vmatpush.bf16.msra.mxu2 %v403_v2  ;;  %469 = vmatpush.bf16.msra.mxu3 %v403_v2 }
   0xe   :  { %183 = vmatpush.bf16.msra.mxu0 %v402_v3  ;;  %470 = vmatpush.bf16.msra.mxu1 %v402_v3 }
   0xf   :  { %471 = vmatpush.bf16.msra.mxu2 %v402_v3  ;;  %472 = vmatpush.bf16.msra.mxu3 %v402_v3 }
  0x12   :  { %184 = vmatpush.bf16.msra.mxu0 %v401_v4  ;;  %473 = vmatpush.bf16.msra.mxu1 %v401_v4 }
  0x13   :  { %474 = vmatpush.bf16.msra.mxu2 %v401_v4  ;;  %475 = vmatpush.bf16.msra.mxu3 %v401_v4 }
  0x16   :  { %185 = vmatpush.bf16.msra.mxu0 %v400_v5  ;;  %476 = vmatpush.bf16.msra.mxu1 %v400_v5 }
  0x17   :  { %477 = vmatpush.bf16.msra.mxu2 %v400_v5  ;;  %478 = vmatpush.bf16.msra.mxu3 %v400_v5 }
  0x1a   :  { %186 = vmatpush.bf16.msra.mxu0 %v399_v6  ;;  %479 = vmatpush.bf16.msra.mxu1 %v399_v6 }
  0x1b   :  { %480 = vmatpush.bf16.msra.mxu2 %v399_v6  ;;  %481 = vmatpush.bf16.msra.mxu3 %v399_v6 }
  0x1e   :  { %187 = vmatpush.bf16.msra.mxu0 %v398_v7  ;;  %482 = vmatpush.bf16.msra.mxu1 %v398_v7 }
  0x1f   :  { %483 = vmatpush.bf16.msra.mxu2 %v398_v7  ;;  %484 = vmatpush.bf16.msra.mxu3 %v398_v7 }
  0x21   :  { %188 = vmatmul.bf16.vlgmr.msra.gmra.mxu0 %v406_v8  ;;  %198 = vmatmul.bf16.vlgmr.msra.gmra.mxu1 %v408_v9 }
  0x22   :  { %208 = vmatmul.bf16.vlgmr.msra.gmra.mxu2 %v410_v10  ;;  %218 = vmatmul.bf16.vlgmr.msra.gmra.mxu3 %v412_v11 }
  0x31   :  { %193 = vmatmul.bf16.gmra.mxu0 %v407_v12  ;;  %203 = vmatmul.bf16.gmra.mxu1 %v409_v13 }
  0x32   :  { %213 = vmatmul.bf16.gmra.mxu2 %v411_v14  ;;  %223 = vmatmul.bf16.gmra.mxu3 %v413_v15 }
  0x9e   :  { %v189_v16 = vpop.f32.mrf.mxu0  ;;  %v199_v17 = vpop.f32.mrf.mxu1 }
  0x9f   :  { %v280_v22 = vmax.f32 %v189_v16, 0.0  ;;  %v284_v23 = vmax.f32 %v199_v17, 0.0 }
  0xa5   :  { %v209_v18 = vpop.f32.mrf.mxu2  ;;  %v219_v19 = vpop.f32.mrf.mxu3 }
  0xa6   :  { %v191_v20 = vpop.f32.mrf.mxu0  ;;  %v201_v21 = vpop.f32.mrf.mxu1  ;;  %v288_v30 = vmax.f32 %v209_v18, 0.0  ;;  %v292_v31 = vmax.f32 %v219_v19, 0.0 }
  0xa7   :  { %v281_v24 = vmax.f32 %v191_v20, 0.0  ;;  %v285_v25 = vmax.f32 %v201_v21, 0.0 }
  0xa9   :  { %v417_v26 = vpack.c.bf16 %v281_v24, %v280_v22  ;;  %v427_v27 = vpack.c.bf16 %v285_v25, %v284_v23 }
  0xab   :  { %418 = vst [vmem:[%s574_s2] sm:$0xff] %v417_v26  }
  0xac   :  { %455 = vst [vmem:[%s574_s2 + $0x10] sm:$0xff] %v427_v27  }
  0xad   :  { %v211_v28 = vpop.f32.mrf.mxu2  ;;  %v221_v29 = vpop.f32.mrf.mxu3 }
  0xae   :  { %v289_v32 = vmax.f32 %v211_v28, 0.0  ;;  %v293_v33 = vmax.f32 %v221_v29, 0.0  ;;  %v194_v34 = vpop.f32.mrf.mxu0  ;;  %v204_v35 = vpop.f32.mrf.mxu1 }
  0xaf   :  { %v282_v42 = vmax.f32 %v194_v34, 0.0  ;;  %v286_v43 = vmax.f32 %v204_v35, 0.0 }
  0xb0   :  { %v437_v36 = vpack.c.bf16 %v289_v32, %v288_v30  ;;  %v447_v37 = vpack.c.bf16 %v293_v33, %v292_v31 }
  0xb2   :  { %457 = vst [vmem:[%s574_s2 + $0x20] sm:$0xff] %v437_v36  }
  0xb3   :  { %459 = vst [vmem:[%s574_s2 + $0x30] sm:$0xff] %v447_v37  }
  0xb5   :  { %v214_v38 = vpop.f32.mrf.mxu2  ;;  %v224_v39 = vpop.f32.mrf.mxu3 }
  0xb6   :  { %v196_v40 = vpop.f32.mrf.mxu0  ;;  %v206_v41 = vpop.f32.mrf.mxu1  ;;  %v290_v50 = vmax.f32 %v214_v38, 0.0  ;;  %v294_v51 = vmax.f32 %v224_v39, 0.0 }
  0xb7   :  { %v283_v44 = vmax.f32 %v196_v40, 0.0  ;;  %v287_v45 = vmax.f32 %v206_v41, 0.0 }
  0xb9   :  { %v422_v46 = vpack.c.bf16 %v283_v44, %v282_v42  ;;  %v432_v47 = vpack.c.bf16 %v287_v45, %v286_v43 }
  0xbb   :  { %454 = vst [vmem:[%s574_s2 + $0x8] sm:$0xff] %v422_v46  }
  0xbc   :  { %456 = vst [vmem:[%s574_s2 + $0x18] sm:$0xff] %v432_v47  }
  0xbd   :  { %v216_v48 = vpop.f32.mrf.mxu2  ;;  %v226_v49 = vpop.f32.mrf.mxu3 }
  0xbe   :  { %v291_v52 = vmax.f32 %v216_v48, 0.0  ;;  %v295_v53 = vmax.f32 %v226_v49, 0.0 }
  0xc0   :  { %v442_v54 = vpack.c.bf16 %v291_v52, %v290_v50  ;;  %v452_v55 = vpack.c.bf16 %v295_v53, %v294_v51 }
  0xc2   :  { %458 = vst [vmem:[%s574_s2 + $0x28] sm:$0xff] %v442_v54  }
  0xc3   :  { %460 = vst [vmem:[%s574_s2 + $0x38] sm:$0xff] %v452_v55  }

// kernel: gcn_forward.7
= control target key start
LH: loop header
LB: loop body
LE: loop exit
PB: predicated region body
PF: predicated region fallthrough
CT: control target
= control target key end

     0   :  { %s483_s1 = inlined_call_operand.vmem [shape: bf16[128,128], index: 1, kind: input, shape index: {}]   ;;  %s484_s0 = inlined_call_operand.vmem [shape: bf16[128,128], index: 0, kind: input, shape index: {}]   ;;  %s485_s2 = inlined_call_operand.vmem [shape: f32[128,128], index: 2, kind: output, shape index: {}]  }
   0x1   :  { %v338_v0 = vld [vmem:[%s483_s1 + $0x38] sm:$0xff]  ;;  %v337_v1 = vld [vmem:[%s483_s1 + $0x30] sm:$0xff]  ;;  %v336_v2 = vld [vmem:[%s483_s1 + $0x28] sm:$0xff] }
   0x2   :  { %180 = vmatpush.bf16.msra.mxu0 %v338_v0  ;;  %347 = vmatpush.bf16.msra.mxu1 %v338_v0  ;;  %v335_v3 = vld [vmem:[%s483_s1 + $0x20] sm:$0xff]  ;;  %v334_v4 = vld [vmem:[%s483_s1 + $0x18] sm:$0xff]  ;;  %v333_v5 = vld [vmem:[%s483_s1 + $0x10] sm:$0xff] }
   0x3   :  { %348 = vmatpush.bf16.msra.mxu2 %v338_v0  ;;  %349 = vmatpush.bf16.msra.mxu3 %v338_v0  ;;  %v332_v6 = vld [vmem:[%s483_s1 + $0x8] sm:$0xff]  ;;  %v331_v7 = vld [vmem:[%s483_s1] sm:$0xff]  ;;  %v341_v9 = vld [vmem:[%s484_s0 + $0x10] sm:$0xff] }
   0x4   :  { %v339_v8 = vld [vmem:[%s484_s0] sm:$0xff]  ;;  %v345_v11 = vld [vmem:[%s484_s0 + $0x30] sm:$0xff]  ;;  %v340_v12 = vld [vmem:[%s484_s0 + $0x8] sm:$0xff] }
   0x5   :  { %v343_v10 = vld [vmem:[%s484_s0 + $0x20] sm:$0xff]  ;;  %v342_v13 = vld [vmem:[%s484_s0 + $0x18] sm:$0xff]  ;;  %v344_v14 = vld [vmem:[%s484_s0 + $0x28] sm:$0xff] }
   0x6   :  { %181 = vmatpush.bf16.msra.mxu0 %v337_v1  ;;  %350 = vmatpush.bf16.msra.mxu1 %v337_v1  ;;  %v346_v15 = vld [vmem:[%s484_s0 + $0x38] sm:$0xff] }
   0x7   :  { %351 = vmatpush.bf16.msra.mxu2 %v337_v1  ;;  %352 = vmatpush.bf16.msra.mxu3 %v337_v1 }
   0xa   :  { %182 = vmatpush.bf16.msra.mxu0 %v336_v2  ;;  %353 = vmatpush.bf16.msra.mxu1 %v336_v2 }
   0xb   :  { %354 = vmatpush.bf16.msra.mxu2 %v336_v2  ;;  %355 = vmatpush.bf16.msra.mxu3 %v336_v2 }
   0xe   :  { %183 = vmatpush.bf16.msra.mxu0 %v335_v3  ;;  %356 = vmatpush.bf16.msra.mxu1 %v335_v3 }
   0xf   :  { %357 = vmatpush.bf16.msra.mxu2 %v335_v3  ;;  %358 = vmatpush.bf16.msra.mxu3 %v335_v3 }
  0x12   :  { %184 = vmatpush.bf16.msra.mxu0 %v334_v4  ;;  %359 = vmatpush.bf16.msra.mxu1 %v334_v4 }
  0x13   :  { %360 = vmatpush.bf16.msra.mxu2 %v334_v4  ;;  %361 = vmatpush.bf16.msra.mxu3 %v334_v4 }
  0x16   :  { %185 = vmatpush.bf16.msra.mxu0 %v333_v5  ;;  %362 = vmatpush.bf16.msra.mxu1 %v333_v5 }
  0x17   :  { %363 = vmatpush.bf16.msra.mxu2 %v333_v5  ;;  %364 = vmatpush.bf16.msra.mxu3 %v333_v5 }
  0x1a   :  { %186 = vmatpush.bf16.msra.mxu0 %v332_v6  ;;  %365 = vmatpush.bf16.msra.mxu1 %v332_v6 }
  0x1b   :  { %366 = vmatpush.bf16.msra.mxu2 %v332_v6  ;;  %367 = vmatpush.bf16.msra.mxu3 %v332_v6 }
  0x1e   :  { %187 = vmatpush.bf16.msra.mxu0 %v331_v7  ;;  %368 = vmatpush.bf16.msra.mxu1 %v331_v7 }
  0x1f   :  { %369 = vmatpush.bf16.msra.mxu2 %v331_v7  ;;  %370 = vmatpush.bf16.msra.mxu3 %v331_v7 }
  0x21   :  { %188 = vmatmul.bf16.vlgmr.msra.gmra.mxu0 %v339_v8  ;;  %198 = vmatmul.bf16.vlgmr.msra.gmra.mxu1 %v341_v9 }
  0x22   :  { %208 = vmatmul.bf16.vlgmr.msra.gmra.mxu2 %v343_v10  ;;  %218 = vmatmul.bf16.vlgmr.msra.gmra.mxu3 %v345_v11 }
  0x31   :  { %193 = vmatmul.bf16.gmra.mxu0 %v340_v12  ;;  %203 = vmatmul.bf16.gmra.mxu1 %v342_v13 }
  0x32   :  { %213 = vmatmul.bf16.gmra.mxu2 %v344_v14  ;;  %223 = vmatmul.bf16.gmra.mxu3 %v346_v15 }
  0x9e   :  { %v189_v16 = vpop.f32.mrf.mxu0  ;;  %v199_v17 = vpop.f32.mrf.mxu1 }
  0x9f   :  { %245 = vst [vmem:[%s485_s2] sm:$0xff] %v189_v16 }
  0xa0   :  { %249 = vst [vmem:[%s485_s2 + $0x20] sm:$0xff] %v199_v17 }
  0xa5   :  { %v209_v18 = vpop.f32.mrf.mxu2  ;;  %v219_v19 = vpop.f32.mrf.mxu3 }
  0xa6   :  { %v191_v20 = vpop.f32.mrf.mxu0  ;;  %v201_v21 = vpop.f32.mrf.mxu1  ;;  %253 = vst [vmem:[%s485_s2 + $0x40] sm:$0xff] %v209_v18 }
  0xa7   :  { %257 = vst [vmem:[%s485_s2 + $0x60] sm:$0xff] %v219_v19 }
  0xa8   :  { %246 = vst [vmem:[%s485_s2 + $0x8] sm:$0xff] %v191_v20 }
  0xa9   :  { %250 = vst [vmem:[%s485_s2 + $0x28] sm:$0xff] %v201_v21 }
  0xad   :  { %v211_v22 = vpop.f32.mrf.mxu2  ;;  %v221_v23 = vpop.f32.mrf.mxu3 }
  0xae   :  { %v194_v24 = vpop.f32.mrf.mxu0  ;;  %v204_v25 = vpop.f32.mrf.mxu1  ;;  %254 = vst [vmem:[%s485_s2 + $0x48] sm:$0xff] %v211_v22 }
  0xaf   :  { %258 = vst [vmem:[%s485_s2 + $0x68] sm:$0xff] %v221_v23 }
  0xb0   :  { %247 = vst [vmem:[%s485_s2 + $0x10] sm:$0xff] %v194_v24 }
  0xb1   :  { %251 = vst [vmem:[%s485_s2 + $0x30] sm:$0xff] %v204_v25 }
  0xb5   :  { %v214_v26 = vpop.f32.mrf.mxu2  ;;  %v224_v27 = vpop.f32.mrf.mxu3 }
  0xb6   :  { %v196_v28 = vpop.f32.mrf.mxu0  ;;  %v206_v29 = vpop.f32.mrf.mxu1  ;;  %255 = vst [vmem:[%s485_s2 + $0x50] sm:$0xff] %v214_v26 }
  0xb7   :  { %259 = vst [vmem:[%s485_s2 + $0x70] sm:$0xff] %v224_v27 }
  0xb8   :  { %248 = vst [vmem:[%s485_s2 + $0x18] sm:$0xff] %v196_v28 }
  0xb9   :  { %252 = vst [vmem:[%s485_s2 + $0x38] sm:$0xff] %v206_v29 }
  0xbd   :  { %v216_v30 = vpop.f32.mrf.mxu2  ;;  %v226_v31 = vpop.f32.mrf.mxu3 }
  0xbe   :  { %256 = vst [vmem:[%s485_s2 + $0x58] sm:$0xff] %v216_v30 }
  0xbf   :  { %260 = vst [vmem:[%s485_s2 + $0x78] sm:$0xff] %v226_v31 }

// kernel: gcn_forward.6
= control target key start
LH: loop header
LB: loop body
LE: loop exit
PB: predicated region body
PF: predicated region fallthrough
CT: control target
= control target key end

     0   :  { %s462_s1 = inlined_call_operand.vmem [shape: bf16[128,128], index: 1, kind: input, shape index: {}]   ;;  %s463_s0 = inlined_call_operand.vmem [shape: bf16[128,128], index: 0, kind: input, shape index: {}]   ;;  %s464_s2 = inlined_call_operand.vmem [shape: bf16[128,128], index: 2, kind: output, shape index: {}]  }
   0x1   :  { %v303_v0 = vld [vmem:[%s462_s1 + $0x38] sm:$0xff]  ;;  %v302_v1 = vld [vmem:[%s462_s1 + $0x30] sm:$0xff]  ;;  %v301_v2 = vld [vmem:[%s462_s1 + $0x28] sm:$0xff] }
   0x2   :  { %139 = vmatpush.bf16.msra.mxu0 %v303_v0  ;;  %351 = vmatpush.bf16.msra.mxu1 %v303_v0  ;;  %v300_v3 = vld [vmem:[%s462_s1 + $0x20] sm:$0xff]  ;;  %v299_v4 = vld [vmem:[%s462_s1 + $0x18] sm:$0xff]  ;;  %v298_v5 = vld [vmem:[%s462_s1 + $0x10] sm:$0xff] }
   0x3   :  { %352 = vmatpush.bf16.msra.mxu2 %v303_v0  ;;  %353 = vmatpush.bf16.msra.mxu3 %v303_v0  ;;  %v297_v6 = vld [vmem:[%s462_s1 + $0x8] sm:$0xff]  ;;  %v296_v7 = vld [vmem:[%s462_s1] sm:$0xff]  ;;  %v290_v9 = vld [vmem:[%s463_s0 + $0x10] sm:$0xff] }
   0x4   :  { %v288_v8 = vld [vmem:[%s463_s0] sm:$0xff]  ;;  %v294_v11 = vld [vmem:[%s463_s0 + $0x30] sm:$0xff]  ;;  %v289_v12 = vld [vmem:[%s463_s0 + $0x8] sm:$0xff] }
   0x5   :  { %v292_v10 = vld [vmem:[%s463_s0 + $0x20] sm:$0xff]  ;;  %v291_v13 = vld [vmem:[%s463_s0 + $0x18] sm:$0xff]  ;;  %v293_v14 = vld [vmem:[%s463_s0 + $0x28] sm:$0xff] }
   0x6   :  { %140 = vmatpush.bf16.msra.mxu0 %v302_v1  ;;  %354 = vmatpush.bf16.msra.mxu1 %v302_v1  ;;  %v295_v15 = vld [vmem:[%s463_s0 + $0x38] sm:$0xff] }
   0x7   :  { %355 = vmatpush.bf16.msra.mxu2 %v302_v1  ;;  %356 = vmatpush.bf16.msra.mxu3 %v302_v1 }
   0xa   :  { %141 = vmatpush.bf16.msra.mxu0 %v301_v2  ;;  %357 = vmatpush.bf16.msra.mxu1 %v301_v2 }
   0xb   :  { %358 = vmatpush.bf16.msra.mxu2 %v301_v2  ;;  %359 = vmatpush.bf16.msra.mxu3 %v301_v2 }
   0xe   :  { %142 = vmatpush.bf16.msra.mxu0 %v300_v3  ;;  %360 = vmatpush.bf16.msra.mxu1 %v300_v3 }
   0xf   :  { %361 = vmatpush.bf16.msra.mxu2 %v300_v3  ;;  %362 = vmatpush.bf16.msra.mxu3 %v300_v3 }
  0x12   :  { %143 = vmatpush.bf16.msra.mxu0 %v299_v4  ;;  %363 = vmatpush.bf16.msra.mxu1 %v299_v4 }
  0x13   :  { %364 = vmatpush.bf16.msra.mxu2 %v299_v4  ;;  %365 = vmatpush.bf16.msra.mxu3 %v299_v4 }
  0x16   :  { %144 = vmatpush.bf16.msra.mxu0 %v298_v5  ;;  %366 = vmatpush.bf16.msra.mxu1 %v298_v5 }
  0x17   :  { %367 = vmatpush.bf16.msra.mxu2 %v298_v5  ;;  %368 = vmatpush.bf16.msra.mxu3 %v298_v5 }
  0x1a   :  { %145 = vmatpush.bf16.msra.mxu0 %v297_v6  ;;  %369 = vmatpush.bf16.msra.mxu1 %v297_v6 }
  0x1b   :  { %370 = vmatpush.bf16.msra.mxu2 %v297_v6  ;;  %371 = vmatpush.bf16.msra.mxu3 %v297_v6 }
  0x1e   :  { %146 = vmatpush.bf16.msra.mxu0 %v296_v7  ;;  %372 = vmatpush.bf16.msra.mxu1 %v296_v7 }
  0x1f   :  { %373 = vmatpush.bf16.msra.mxu2 %v296_v7  ;;  %374 = vmatpush.bf16.msra.mxu3 %v296_v7 }
  0x21   :  { %147 = vmatmul.bf16.vlgmr.msra.gmra.mxu0 %v288_v8  ;;  %157 = vmatmul.bf16.vlgmr.msra.gmra.mxu1 %v290_v9 }
  0x22   :  { %167 = vmatmul.bf16.vlgmr.msra.gmra.mxu2 %v292_v10  ;;  %177 = vmatmul.bf16.vlgmr.msra.gmra.mxu3 %v294_v11 }
  0x31   :  { %152 = vmatmul.bf16.gmra.mxu0 %v289_v12  ;;  %162 = vmatmul.bf16.gmra.mxu1 %v291_v13 }
  0x32   :  { %172 = vmatmul.bf16.gmra.mxu2 %v293_v14  ;;  %182 = vmatmul.bf16.gmra.mxu3 %v295_v15 }
  0x9e   :  { %v148_v16 = vpop.f32.mrf.mxu0  ;;  %v158_v17 = vpop.f32.mrf.mxu1 }
  0xa5   :  { %v168_v18 = vpop.f32.mrf.mxu2  ;;  %v178_v19 = vpop.f32.mrf.mxu3 }
  0xa6   :  { %v150_v20 = vpop.f32.mrf.mxu0  ;;  %v160_v21 = vpop.f32.mrf.mxu1 }
  0xa7   :  { %v307_v22 = vpack.c.bf16 %v150_v20, %v148_v16  ;;  %v317_v23 = vpack.c.bf16 %v160_v21, %v158_v17 }
  0xa9   :  { %308 = vst [vmem:[%s464_s2] sm:$0xff] %v307_v22  }
  0xaa   :  { %345 = vst [vmem:[%s464_s2 + $0x10] sm:$0xff] %v317_v23  }
  0xad   :  { %v170_v24 = vpop.f32.mrf.mxu2  ;;  %v180_v25 = vpop.f32.mrf.mxu3 }
  0xae   :  { %v327_v26 = vpack.c.bf16 %v170_v24, %v168_v18  ;;  %v337_v27 = vpack.c.bf16 %v180_v25, %v178_v19  ;;  %v153_v28 = vpop.f32.mrf.mxu0  ;;  %v163_v29 = vpop.f32.mrf.mxu1 }
  0xb0   :  { %347 = vst [vmem:[%s464_s2 + $0x20] sm:$0xff] %v327_v26  }
  0xb1   :  { %349 = vst [vmem:[%s464_s2 + $0x30] sm:$0xff] %v337_v27  }
  0xb5   :  { %v173_v30 = vpop.f32.mrf.mxu2  ;;  %v183_v31 = vpop.f32.mrf.mxu3 }
  0xb6   :  { %v155_v32 = vpop.f32.mrf.mxu0  ;;  %v165_v33 = vpop.f32.mrf.mxu1 }
  0xb7   :  { %v312_v34 = vpack.c.bf16 %v155_v32, %v153_v28  ;;  %v322_v35 = vpack.c.bf16 %v165_v33, %v163_v29 }
  0xb9   :  { %344 = vst [vmem:[%s464_s2 + $0x8] sm:$0xff] %v312_v34  }
  0xba   :  { %346 = vst [vmem:[%s464_s2 + $0x18] sm:$0xff] %v322_v35  }
  0xbd   :  { %v175_v36 = vpop.f32.mrf.mxu2  ;;  %v185_v37 = vpop.f32.mrf.mxu3 }
  0xbe   :  { %v332_v38 = vpack.c.bf16 %v175_v36, %v173_v30  ;;  %v342_v39 = vpack.c.bf16 %v185_v37, %v183_v31 }
  0xc0   :  { %348 = vst [vmem:[%s464_s2 + $0x28] sm:$0xff] %v332_v38  }
  0xc1   :  { %350 = vst [vmem:[%s464_s2 + $0x38] sm:$0xff] %v342_v39  }

</bundles_post_ra>
